<compile_context>
chip_gen: v7x
topology: tpu7x:2x2x1
jax: 0.10.0
libtpu: 0.0.40
codegen_flags: <defaults>
</compile_context>

<pallas_src>
import math

import numpy as np
import jax
import jax.numpy as jnp
from jax import lax
from jax.experimental import pallas as pl
from jax.experimental.pallas import tpu as pltpu


# ----------------------------------------------------------------------------
# pltpu.roll shift-convention probe (one tiny pallas_call, cached).
# Kept (vs. a hard-coded constant) so the left-roll direction is guaranteed in
# the same execution mode that runs the real kernels.
# ----------------------------------------------------------------------------
_ROLL_MATCHES_NUMPY = None


def _roll_matches_numpy():
    """True iff pltpu.roll follows np.roll's convention rolled[i] = x[i - shift]."""
    global _ROLL_MATCHES_NUMPY
    if _ROLL_MATCHES_NUMPY is None:
        x = jnp.arange(8 * 128, dtype=jnp.float32).reshape(8, 128)

        def probe(x_ref, o_ref):
            o_ref[...] = pltpu.roll(x_ref[...], 1, 1)

        y = pl.pallas_call(
            probe, out_shape=jax.ShapeDtypeStruct((8, 128), jnp.float32))(x)
        _ROLL_MATCHES_NUMPY = bool(np.asarray(y)[0, 0] == 127.0)
    return _ROLL_MATCHES_NUMPY


def _left_roll_shifts(offsets, size):
    """Static pltpu.roll shift amounts implementing rolled[s] = x[s + off]."""
    if _roll_matches_numpy():
        return tuple(0 if off == 0 else size - off for off in offsets)
    return tuple(offsets)


# ----------------------------------------------------------------------------
# Small helpers
# ----------------------------------------------------------------------------
def _pick_tile(dim, target):
    """Largest divisor of `dim` that is <= target and a multiple of 8; else dim."""
    if dim <= target:
        return dim
    for t in range(target, 7, -1):
        if dim % t == 0 and t % 8 == 0:
            return t
    return dim


def _compiler_params(working_set_bytes):
    """Scoped-VMEM request sized from the actual (double-buffered) block working
    set plus compiler headroom — never a flat 64 MiB (all of v7x's physical
    VMEM per TensorCore)."""
    lim = 2 * int(working_set_bytes) + 16 * 1024 * 1024
    lim = max(32 * 1024 * 1024, min(lim, 96 * 1024 * 1024))
    return pltpu.CompilerParams(
        dimension_semantics=("parallel", "parallel"),
        vmem_limit_bytes=lim)


# ----------------------------------------------------------------------------
# Wrapper-side layout plumbing (conv path) — pure XLA at the boundary.
# ----------------------------------------------------------------------------
def _space_to_depth(x_nchw):
    """(N, C, 2R, 2S) -> (N, 4C, R, S) with channel index k = (2p + q)*C + c,
    i.e. y[n, k, r, s] = x[n, c, 2r + p, 2s + q]."""
    N, C, H, W = x_nchw.shape
    y = x_nchw.reshape(N, C, H // 2, 2, W // 2, 2)
    y = jnp.transpose(y, (0, 3, 5, 1, 2, 4))
    return y.reshape(N, 4 * C, H // 2, W // 2)


def _make_tap_weights(w_oihw):
    """Per-tap weights for the 2x2 conv on the space-to-depth input.

    Returns (4, Cout, 4*Cin); tap t = 2*a + b contributes
      out[:, oy, ox] += W[t] @ ypad[:, oy + a, ox + b]
    where ypad is the space-to-depth input zero-padded by one row (top) and one
    column (left).  Taps mapping to 3x3 offsets outside [0, 3) get zero weight.
    """
    Cout, Cin = w_oihw.shape[0], w_oihw.shape[1]
    taps = []
    for a in (0, 1):
        for b in (0, 1):
            blocks = []
            for p in (0, 1):
                for q in (0, 1):
                    dy, dx = 2 * a + p - 1, 2 * b + q - 1
                    if 0 <= dy < 3 and 0 <= dx < 3:
                        blocks.append(w_oihw[:, :, dy, dx])        # (Cout, Cin)
                    else:
                        blocks.append(jnp.zeros((Cout, Cin), w_oihw.dtype))
            taps.append(jnp.concatenate(blocks, axis=1))           # (Cout, 4Cin)
    return jnp.stack(taps, axis=0)                                  # (4, Cout, 4Cin)


# ----------------------------------------------------------------------------
# Kernels
# ----------------------------------------------------------------------------
def _make_conv_kernel_fused(shifts):
    """Stride-2 3x3 conv as ONE MXU matmul with K = 16*Cin (taps stacked on K)."""

    def kernel(y_ref, w_ref, b_ref, o_ref):
        # y_ref: (1, Kc, Sp)     lane-flattened padded spatial, channel-phase major
        # w_ref: (Cout_t, 4*Kc)  taps concatenated along K
        # b_ref: (Cout_t, 1)     f32 bias
        # o_ref: (1, Cout_t, Sp) lane-dense NCHW-flat output slab
        y = y_ref[0]
        taps = [y if s == 0 else pltpu.roll(y, s, 1) for s in shifts]  # XLU rolls
        ystk = jnp.concatenate(taps, axis=0)                           # (4*Kc, Sp)
        o = jnp.dot(w_ref[...], ystk, preferred_element_type=jnp.float32)
        o_ref[0] = (o + b_ref[...]).astype(o_ref.dtype)                # single store

    return kernel


def _make_conv_kernel_sum(shifts):
    """Large-Cin variant: 4 matmuls summed as a value expression (no VMEM acc)."""

    def kernel(y_ref, w_ref, b_ref, o_ref):
        # y_ref: (1, Kc, Sp); w_ref: (4, Cout_t, Kc); b_ref: (Cout_t, 1)
        y = y_ref[0]
        o = None
        for t, s in enumerate(shifts):
            yt = y if s == 0 else pltpu.roll(y, s, 1)
            d = jnp.dot(w_ref[t], yt, preferred_element_type=jnp.float32)
            o = d if o is None else o + d
        o_ref[0] = (o + b_ref[...]).astype(o_ref.dtype)

    return kernel


def _avgpool_kernel(x_ref, p_ref, o_ref):
    # x_ref: (1, Mt, 2W) rows = [x[c, 2r, :] | x[c, 2r+1, :]]  (free NCHW reshape)
    # p_ref: (W, Wout)   column-pairing matrix (0.25 at [2wo, wo] and [2wo+1, wo])
    # o_ref: (1, Mt, Wout)
    x = x_ref[0].astype(jnp.float32)
    w = x.shape[1] // 2
    rowsum = x[:, :w] + x[:, w:]                       # vertical 2x1 pool (VPU)
    o_ref[0] = jnp.dot(rowsum, p_ref[...],
                       preferred_element_type=jnp.float32).astype(o_ref.dtype)


# ----------------------------------------------------------------------------
# Forward
# ----------------------------------------------------------------------------
def downsample_forward(x_nchw, use_conv, w_oihw=None, bias=None,
                       compute_dtype=None):
    """Downsample forward.  x_nchw: (N, C, H, W) -> (N, Cout, H//2, W//2).

    compute_dtype: activation/weight dtype for the conv matmuls (accumulation is
    always f32).  Pass jnp.bfloat16 on v6e/v7x to halve HBM traffic.
    """
    N, C, H, W = x_nchw.shape
    assert H % 2 == 0 and W % 2 == 0, "even spatial dims expected"
    # TODO(synk): odd H/W would need an extra bottom/right zero pad (conv) /
    # truncation (pool) before the downsample.
    Hout, Wout = H // 2, W // 2
    out_dtype = x_nchw.dtype

    if not use_conv:
        # ---- AvgPool2d(2, 2): zero wrapper copies ----
        M = C * Hout
        x2 = x_nchw.reshape(N, M, 2 * W)               # free row-major reshape
        pw = np.zeros((W, Wout), np.float32)
        pw[2 * np.arange(Wout), np.arange(Wout)] = 0.25
        pw[2 * np.arange(Wout) + 1, np.arange(Wout)] = 0.25
        pw = jnp.asarray(pw)

        mt = _pick_tile(M, 1024)                       # row tiling for big images
        xs = x2.dtype.itemsize
        blk = (mt * 2 * W * xs + W * Wout * 4 + mt * W * 4
               + mt * Wout * jnp.dtype(out_dtype).itemsize)
        out = pl.pallas_call(
            _avgpool_kernel,
            out_shape=jax.ShapeDtypeStruct((N, M, Wout), out_dtype),
            grid_spec=pltpu.PrefetchScalarGridSpec(
                num_scalar_prefetch=0,
                grid=(N, M // mt),
                in_specs=[pl.BlockSpec((1, mt, 2 * W), lambda n, j: (n, j, 0)),
                          pl.BlockSpec((W, Wout), lambda n, j: (0, 0))],
                out_specs=pl.BlockSpec((1, mt, Wout), lambda n, j: (n, j, 0)),
            ),
            compiler_params=_compiler_params(blk),
        )(x2, pw)
        return out.reshape(N, C, Hout, Wout)           # free reshape

    # ---- conv path: stride-2 3x3 conv, padding=1 (polyphase / space-to-depth) ----
    cdt = compute_dtype or x_nchw.dtype
    Cout = w_oihw.shape[0]
    Kc = 4 * C
    Hp, Wp = Hout + 1, Wout + 1          # one zero row (top) / column (left)
    S = Hp * Wp
    Sp = ((S + 127) // 128) * 128        # lane-dense, 128-aligned flattened spatial
    # pltpu.roll wraps around the Sp lane axis; safe because the largest tap
    # offset is Wp+1 and every valid flat index + (Wp+1) <= S-1 < Sp.  This
    # invariant forbids naive lane-tiling of Sp (use row tiling with halos).
    assert (Hout - 1) * Wp + (Wout - 1) + (Wp + 1) < Sp

    y = _space_to_depth(x_nchw)                                   # (N, Kc, Hout, Wout)
    y = jnp.pad(y, ((0, 0), (0, 0), (1, 0), (1, 0)))              # pad top/left
    y = y.reshape(N, Kc, S)
    y = jnp.pad(y, ((0, 0), (0, 0), (0, Sp - S))).astype(cdt)     # (N, Kc, Sp)
    # (XLA fuses the transpose + both pads into one producer fusion.)
    # TODO(synk): try CompilerParams(allow_input_fusion=...) to elide this HBM pass.

    wt = _make_tap_weights(w_oihw)                                # (4, Cout, Kc)
    b2 = bias.reshape(Cout, 1).astype(jnp.float32)
    # lane-roll offsets for taps (a, b) = (0,0), (0,1), (1,0), (1,1)
    shifts = _left_roll_shifts((0, 1, Wp, Wp + 1), Sp)

    cout_t = _pick_tile(Cout, 256)       # extra grid steps / megacore work at N=1
    if Kc < 256:
        # Small K: fuse all 4 taps into one matmul with K = 16*Cin (MXU-internal acc).
        w_arg = wt.transpose(1, 0, 2).reshape(Cout, 4 * Kc).astype(cdt)
        w_spec = pl.BlockSpec((cout_t, 4 * Kc), lambda n, j: (j, 0))
        kernel = _make_conv_kernel_fused(shifts)
    else:
        # K already fills the MXU: keep 4 matmuls, summed as values (no VMEM acc).
        w_arg = wt.astype(cdt)
        w_spec = pl.BlockSpec((4, cout_t, Kc), lambda n, j: (0, j, 0))
        kernel = _make_conv_kernel_sum(shifts)

    cs = jnp.dtype(cdt).itemsize
    os_ = jnp.dtype(out_dtype).itemsize
    blk = (Kc * Sp * cs + 4 * Kc * cout_t * cs + cout_t * 4
           + cout_t * Sp * os_ + 4 * Kc * Sp * cs + cout_t * Sp * 4)

    out = pl.pallas_call(
        kernel,
        out_shape=jax.ShapeDtypeStruct((N, Cout, Sp), out_dtype),
        grid_spec=pltpu.PrefetchScalarGridSpec(
            num_scalar_prefetch=0,
            grid=(N, Cout // cout_t),
            in_specs=[
                # Image block ignores j -> Pallas skips re-fetch across Cout tiles.
                pl.BlockSpec((1, Kc, Sp), lambda n, j: (n, 0, 0)),
                w_spec,
                pl.BlockSpec((cout_t, 1), lambda n, j: (j, 0)),
            ],
            out_specs=pl.BlockSpec((1, cout_t, Sp), lambda n, j: (n, j, 0)),
        ),
        compiler_params=_compiler_params(blk),
    )(y, w_arg, b2)
    # TODO(synk): for very large images on v7x (64 MiB VMEM / TC), add row tiling
    # over padded output rows with a 1-row halo instead of whole-image blocks.

    # Strip the padded grid columns/rows (small output-side plumbing).
    out = out[:, :, :S].reshape(N, Cout, Hp, Wp)[:, :, :Hout, :Wout]
    return out


# ----------------------------------------------------------------------------
# Pure-JAX reference matching PyTorch semantics
# ----------------------------------------------------------------------------
def reference_forward(x_nchw, use_conv, w_oihw=None, bias=None):
    if use_conv:
        out = lax.conv_general_dilated(
            x_nchw, w_oihw, window_strides=(2, 2), padding=((1, 1), (1, 1)),
            dimension_numbers=('NCHW', 'OIHW', 'NCHW'),
            precision=lax.Precision.HIGHEST)
        return out + bias.reshape(1, -1, 1, 1)
    N, C, H, W = x_nchw.shape
    return x_nchw.reshape(N, C, H // 2, 2, W // 2, 2).mean(axis=(3, 5))


if __name__ == "__main__":
    N, C, H, W = 2, 4, 16, 16
    Cout = 8

    key = jax.random.PRNGKey(0)
    kx, kw, kb = jax.random.split(key, 3)
    x = jax.random.normal(kx, (N, C, H, W), jnp.float32)

    # Deterministic Conv2d(C, Cout, 3, stride=2, padding=1) params
    # (PyTorch-style uniform init).
    fan_in = C * 3 * 3
    bound = 1.0 / math.sqrt(fan_in)
    w_oihw = jax.random.uniform(kw, (Cout, C, 3, 3), jnp.float32, -bound, bound)
    bias = jax.random.uniform(kb, (Cout,), jnp.float32, -bound, bound)

    # use_conv=True, f32 compute
    y = jax.block_until_ready(downsample_forward(x, True, w_oihw, bias))
    y_ref = reference_forward(x, True, w_oihw, bias)
    assert y.shape == (N, Cout, H // 2, W // 2)
    np.testing.assert_allclose(np.asarray(y), np.asarray(y_ref),
                               rtol=1e-4, atol=1e-4)

    # use_conv=True, bf16 activations/weights (f32 accumulate): halves HBM traffic
    y_bf16 = jax.block_until_ready(
        downsample_forward(x, True, w_oihw, bias, compute_dtype=jnp.bfloat16))
    np.testing.assert_allclose(np.asarray(y_bf16), np.asarray(y_ref),
                               rtol=5e-2, atol=5e-2)

    # use_conv=False: AvgPool2d(kernel_size=2, stride=2), channels == out_channel
    y_pool = jax.block_until_ready(downsample_forward(x, False))
    y_pool_ref = reference_forward(x, False)
    assert y_pool.shape == (N, C, H // 2, W // 2)
    np.testing.assert_allclose(np.asarray(y_pool), np.asarray(y_pool_ref),
                               rtol=1e-4, atol=1e-4)

    print("KERNEL_OK")
</pallas_src>

<mosaic_0001>
module attributes {stable_mosaic.version = 11 : i64} {
  func.func @probe(%arg0: memref<8x128xf32, #tpu.memory_space<vmem>>, %arg1: memref<8x128xf32, #tpu.memory_space<vmem>>) attributes {dimension_semantics = [], scalar_prefetch = 0 : i64, scratch_operands = 0 : i64, tpu.core_type = #tpu.core_type<tc>} {
    %c0 = arith.constant 0 : index
    %c0_0 = arith.constant 0 : index
    %0 = vector.load %arg0[%c0, %c0_0] : memref<8x128xf32, #tpu.memory_space<vmem>>, vector<8x128xf32>
    %c1_i32 = arith.constant 1 : i32
    %1 = tpu.dynamic_rotate %0 by %c1_i32 dim 1 : vector<8x128xf32>, i32 -> vector<8x128xf32>
    %c0_1 = arith.constant 0 : index
    %c0_2 = arith.constant 0 : index
    %2 = vector.load %arg1[%c0_1, %c0_2] : memref<8x128xf32, #tpu.memory_space<vmem>>, vector<8x128xf32>
    tpu.vector_store %arg1[%c0_1, %c0_2], %1 {strides = array<i32>} : memref<8x128xf32, #tpu.memory_space<vmem>>, vector<8x128xf32>,
    return
  }
}

</mosaic_0001>

<bundles_post_ra>
// kernel: tpu_custom_call.1
= control target key start
LH: loop header
LB: loop body
LE: loop exit
PB: predicated region body
PF: predicated region fallthrough
CT: control target
= control target key end

     0   :  { %6 = vsyncpa [#allocation3], 0  ;;  %s128_s0 = inlined_call_operand.hbm [shape: f32[8,128], index: 0, kind: input, shape index: {}]   ;;  %s129_s1 = inlined_call_operand.hbm [shape: f32[8,128], index: 1, kind: output, shape index: {}]  }
   0x1   :  { %7 = vsyncpa [#allocation4], 0  ;;  %s91_s6 = smov [#allocation2]   ;;  %s43_s10 = scalar_lea.hbm %s128_s0, 128 }
   0x2   :  { %s14_s7 = sshll.u32 %s91_s6, 4  ;;  %p44_p0 = scmp.ne.s32.totalorder %s128_s0, %s43_s10  ;;  %s15_s7 = int_to_ptr.vmem [resolvable:$true] %s14_s7 }
   0x3   :  { %p47_p1 = scmp.lt.u32.totalorder %s43_s10, %s128_s0 }
   0x5   :  { %p49_p2 = pnand %p47_p1, %p44_p0 }
   0x7   :  { %52 = shalt.err (!%p49_p2)
}
   0x8   :  { %s53_s15 = scalar_lea.vmem %s15_s7, 128  ;;  %p58_p4 = scmp.lt.s32.totalorder %s15_s7, %s15_s7 }
   0x9   :  { %p54_p3 = scmp.ne.s32.totalorder %s15_s7, %s53_s15  ;;  %p59_p5 = scmp.lt.s32.totalorder %s53_s15, %s53_s15 }
   0xb   :  { %p60_p6 = por %p59_p5, %p58_p4 }
   0xd   :  { %p61_p7 = pnand %p60_p6, %p54_p3 }
   0xf   :  { %64 = shalt.err (!%p61_p7)
}
  0x10   :  { %17 = dma.hbm_to_vmem [thread:$0]  %s128_s0, 128, %s15_s7, [#allocation3]  }
  0x11   :  { %87 = dma.done.wait [#allocation3], 128  }
  0x12   :  { %88 = vsyncadd [#allocation3], 4294967168  ;;  %v21_v0 = vld [vmem:[#allocation2] sm:$0xff]  ;;  %s92_s18 = smov 1   ;;  %s93_s19 = smov [#allocation5]  }
  0x13   :  { %22 = vrot.lane.b32.xlu0 %v21_v0, %s92_s18  ;;  %s31_s20 = sshll.u32 %s93_s19, 4  ;;  %s32_s20 = int_to_ptr.vmem [resolvable:$true] %s31_s20 }
  0x14   :  { %s65_s21 = scalar_lea.vmem %s32_s20, 128  ;;  %p70_p9 = scmp.lt.s32.totalorder %s32_s20, %s32_s20 }
  0x15   :  { %p66_p8 = scmp.ne.s32.totalorder %s32_s20, %s65_s21  ;;  %p71_p10 = scmp.lt.s32.totalorder %s65_s21, %s65_s21 }
  0x17   :  { %p72_p11 = por %p71_p10, %p70_p9 }
  0x19   :  { %p73_p12 = pnand %p72_p11, %p66_p8 }
  0x85   :  { %v23_v1 = vpop.permute.xlu0 %22 }
  0x86   :  { %24 = vst [vmem:[#allocation5] sm:$0xff] %v23_v1 }
  0x87   :  { %76 = shalt.err (!%p73_p12)
}
  0x88   :  { %s77_s0 = scalar_lea.hbm %s129_s1, 128 }
  0x89   :  { %p78_p13 = scmp.ne.s32.totalorder %s129_s1, %s77_s0  ;;  %p81_p0 = scmp.lt.u32.totalorder %s77_s0, %s129_s1 }
  0x8b   :  { %p83_p1 = pnand %p81_p0, %p78_p13 }
  0x8d   :  { %86 = shalt.err (!%p83_p1)
}
  0x8e   :  { %34 = dma.vmem_to_hbm [thread:$0]  %s32_s20, 128, %s129_s1, [#allocation4]  }
  0x8f   :  { %89 = dma.done.wait [#allocation4], 128  }
  0x90   :  { %90 = vsyncadd [#allocation4], 4294967168 }
  0x91   :  { %38 = vsyncpa [#allocation3], 1 }
  0x92   :  { %39 = vsyncpa [#allocation4], 1 }

</bundles_post_ra>
